<compile_context>
chip_gen: v6e
topology: v6e:2x2x1
jax: 0.10.0
libtpu: 0.0.40
codegen_flags: <defaults>
</compile_context>

<pallas_src>
import functools

import jax
import jax.numpy as jnp
from jax import lax
from jax.experimental import pallas as pl
from jax.experimental.pallas import tpu as pltpu


def _round_up(x, m):
    return (x + m - 1) // m * m


def _dqn_kernel(params_ref, x_ref, o_ref, *, layer_dims, block_rows):
    """Fused MLP forward on one batch tile.

    params_ref : (n_layers * block_rows, pack_cols) packed weights + biases.
                 Layer i weight W_i (out_i, in_i) lives at rows
                 [i*block_rows : i*block_rows + out_i], cols [0:in_i]; its
                 bias lives in column in_i of the same rows.
    x_ref      : (TB, input_dim)    -- natural (row-major) input layout.
    o_ref      : (num_actions, TB)  -- batch on the lane axis (lane-dense).
    """
    n = len(layer_dims)

    # Layer 0: NT matmul contracting dim 1 of W0 (out0, in0) with dim 1 of
    # x (TB, in0) -> (out0, TB).  Puts the batch on lanes with no host- or
    # kernel-side transpose of x.
    out0, in0 = layer_dims[0]
    w0 = params_ref[0:out0, 0:in0]                        # (out0, in0)
    b0 = params_ref[0:out0, in0:in0 + 1]                  # (out0, 1)
    h = lax.dot_general(
        w0, x_ref[...].astype(jnp.float32),
        (((1,), (1,)), ((), ())),
        preferred_element_type=jnp.float32) + b0
    if n > 1:
        h = jnp.maximum(h, 0.0)

    # Remaining layers: canonical (out, in) @ (in, TB) batch-on-lanes matmuls.
    for i in range(1, n):
        out_f, in_f = layer_dims[i]
        base = i * block_rows                             # static offsets
        w = params_ref[base:base + out_f, 0:in_f]         # (out_f, in_f)
        b = params_ref[base:base + out_f, in_f:in_f + 1]  # (out_f, 1)
        h = jnp.dot(w, h, preferred_element_type=jnp.float32) + b
        if i < n - 1:
            h = jnp.maximum(h, 0.0)

    o_ref[...] = h.astype(o_ref.dtype)


def pack_params(params):
    """Pack [(W, b)] (PyTorch layout: W (out, in), b (out,)) into one
    (8,128)-padded f32 buffer of shape (n_layers*block_rows, pack_cols).
    Layer i: W at rows [i*block_rows : +out_i] cols [0:in_i]; bias at
    column in_i of the same rows."""
    n = len(params)
    max_out = max(w.shape[0] for w, _ in params)
    max_in = max(w.shape[1] for w, _ in params)
    block_rows = _round_up(max_out, 8)
    pack_cols = _round_up(max_in + 1, 128)
    buf = jnp.zeros((n * block_rows, pack_cols), jnp.float32)
    for i, (w, b) in enumerate(params):
        out_f, in_f = w.shape
        assert in_f + 1 <= pack_cols, "bias column would collide with weights"
        assert b.shape == (out_f,)
        r0 = i * block_rows
        buf = buf.at[r0:r0 + out_f, 0:in_f].set(w.astype(jnp.float32))
        buf = buf.at[r0:r0 + out_f, in_f].set(b.astype(jnp.float32))
    return buf, block_rows, pack_cols


def make_dqn_forward(params, *, max_block_batch=8192,
                     vmem_limit_bytes=32 * 1024 * 1024):
    """Build a jitted forward(x) closing over the packed DQN parameters.

    params          : list of (W, b), PyTorch layout (W: (out, in), b: (out,)).
    max_block_batch : batch-tile upper bound, multiple of 128.  8192 fits the
                      32 MiB scoped VMEM on all of v5e/v6e/v7x; raise together
                      with vmem_limit_bytes on v6e/v5e for very large batches.
    """
    assert max_block_batch % 128 == 0, "batch tile must be a multiple of 128"
    packed, block_rows, pack_cols = pack_params(params)
    layer_dims = tuple((w.shape[0], w.shape[1]) for w, _ in params)
    n_layers = len(layer_dims)
    input_dim = layer_dims[0][1]
    num_actions = layer_dims[-1][0]
    param_rows = n_layers * block_rows

    kernel = functools.partial(_dqn_kernel, layer_dims=layer_dims,
                               block_rows=block_rows)

    @jax.jit
    def forward(x):
        batch = x.shape[0]
        assert x.shape == (batch, input_dim)
        # Pad the batch to a whole number of full, lane-dense tiles (no
        # reliance on edge-block OOB reads).  Folds away when already aligned.
        tb = min(max_block_batch, _round_up(batch, 128))
        b_pad = _round_up(batch, tb)
        xp = x.astype(jnp.float32)
        if b_pad != batch:
            xp = jnp.pad(xp, ((0, b_pad - batch), (0, 0)))
        grid = (b_pad // tb,)

        flops = 2 * b_pad * sum(o * i for o, i in layer_dims)
        bytes_accessed = 4 * (b_pad * input_dim + b_pad * num_actions
                              + param_rows * pack_cols)

        out_t = pl.pallas_call(
            kernel,
            out_shape=jax.ShapeDtypeStruct((num_actions, b_pad), jnp.float32),
            grid=grid,
            in_specs=[
                # Packed parameters: constant block index -> DMA'd once and
                # VMEM-resident; single-buffered (the block never changes).
                pl.BlockSpec((param_rows, pack_cols), lambda i: (0, 0),
                             pipeline_mode=pl.Buffered(1)),
                # Input tile in natural layout; last dim equals the full
                # array dim so the (8,128) block rule is satisfied.
                pl.BlockSpec((tb, input_dim), lambda i: (i, 0)),
            ],
            # Lane-dense output tile: batch on the 128-lane axis.
            out_specs=pl.BlockSpec((num_actions, tb), lambda i: (0, i)),
            compiler_params=pltpu.CompilerParams(
                dimension_semantics=("parallel",),
                vmem_limit_bytes=vmem_limit_bytes),
            cost_estimate=pl.CostEstimate(
                flops=int(flops), transcendentals=0,
                bytes_accessed=int(bytes_accessed)),
        )(packed, xp)

        # Tiny (num_actions, B) -> (B, num_actions) layout fix + strip pad.
        return jnp.transpose(out_t)[:batch]

    return forward


def init_dqn_params(key, num_actions, input_dim=4):
    """PyTorch-style nn.Linear init: U(-1/sqrt(fan_in), 1/sqrt(fan_in)),
    stored in PyTorch layout W (out_features, in_features), b (out_features,)."""
    dims = [input_dim, 32, 64, 32, 16, num_actions]
    params = []
    for fan_in, fan_out in zip(dims[:-1], dims[1:]):
        key, kw, kb = jax.random.split(key, 3)
        bound = 1.0 / jnp.sqrt(jnp.float32(fan_in))
        w = jax.random.uniform(kw, (fan_out, fan_in), jnp.float32,
                               minval=-bound, maxval=bound)
        b = jax.random.uniform(kb, (fan_out,), jnp.float32,
                               minval=-bound, maxval=bound)
        params.append((w, b))
    return params


def _reference_forward(x, params):
    h = x.astype(jnp.float32)
    n = len(params)
    for i, (w, b) in enumerate(params):
        h = jnp.dot(h, w.T, precision=jax.lax.Precision.HIGHEST) + b
        if i < n - 1:
            h = jnp.maximum(h, 0.0)
    return h


if __name__ == "__main__":
    num_actions = 2
    input_dim = 4

    key = jax.random.PRNGKey(0)
    key, xkey, xkey2 = jax.random.split(key, 3)

    params = init_dqn_params(key, num_actions=num_actions, input_dim=input_dim)

    # Default forward: params packed once at init, one dispatch per call.
    forward = make_dqn_forward(params)

    # Small batch (pads to a single 128-lane tile, single grid step).
    batch = 8
    x = jax.random.normal(xkey, (batch, input_dim), jnp.float32)
    out = jax.block_until_ready(forward(x))
    ref = _reference_forward(x, params)
    assert out.shape == (batch, num_actions)
    assert jnp.allclose(out, ref, atol=1e-3, rtol=1e-3)

    # Multi-step grid (small tile forced via max_block_batch) with a
    # non-multiple-of-128 batch: exercises padding and the parallel batch
    # grid with the packed weights staying VMEM-resident across steps.
    forward_tiled = make_dqn_forward(params, max_block_batch=256)
    batch2 = 1000
    xb = jax.random.normal(xkey2, (batch2, input_dim), jnp.float32)
    out_b = jax.block_until_ready(forward_tiled(xb))
    ref_b = _reference_forward(xb, params)
    assert out_b.shape == (batch2, num_actions)
    assert jnp.allclose(out_b, ref_b, atol=1e-3, rtol=1e-3)

    print("KERNEL_OK")
</pallas_src>

<mosaic_0001>
module attributes {stable_mosaic.version = 11 : i64} {
  func.func @_dqn_kernel(%arg0: i32, %arg1: memref<320x128xf32, #tpu.memory_space<vmem>>, %arg2: memref<128x4xf32, #tpu.memory_space<vmem>>, %arg3: memref<2x128xf32, #tpu.memory_space<vmem>>) attributes {dimension_semantics = [#tpu.dimension_semantics<parallel>], iteration_bounds = array<i64: 1>, scalar_prefetch = 0 : i64, scratch_operands = 0 : i64, tpu.core_type = #tpu.core_type<tc>, window_params = [{pipeline_mode = #tpu.pipeline_mode<synchronous>, transform_indices = @transform_0, window_bounds = array<i64: 320, 128>}, {transform_indices = @transform_1, window_bounds = array<i64: 128, 4>}, {transform_indices = @transform_2, window_bounds = array<i64: 2, 128>}]} {
    %c0 = arith.constant 0 : index
    %c0_0 = arith.constant 0 : index
    %0 = vector.load %arg1[%c0, %c0_0] : memref<320x128xf32, #tpu.memory_space<vmem>>, vector<32x4xf32>
    %c0_1 = arith.constant 0 : index
    %c4 = arith.constant 4 : index
    %1 = vector.load %arg1[%c0_1, %c4] : memref<320x128xf32, #tpu.memory_space<vmem>>, vector<32x1xf32>
    %c0_2 = arith.constant 0 : index
    %c0_3 = arith.constant 0 : index
    %2 = vector.load %arg2[%c0_2, %c0_3] : memref<128x4xf32, #tpu.memory_space<vmem>>, vector<128x4xf32>
    %cst = arith.constant dense<0.000000e+00> : vector<32x128xf32>
    %3 = tpu.matmul %0, %2, %cst {dimension_numbers = #tpu.dot_dimension_numbers<[1], [1], [0], [0], [0, 0, 1, 0], [], []>} : vector<32x4xf32>, vector<128x4xf32>, vector<32x128xf32> -> vector<32x128xf32>
    %4 = vector.broadcast %1 : vector<32x1xf32> to vector<32x128xf32>
    %5 = arith.addf %3, %4 : vector<32x128xf32>
    %cst_4 = arith.constant 0.000000e+00 : f32
    %6 = vector.broadcast %cst_4 : f32 to vector<32x128xf32>
    %7 = arith.maximumf %5, %6 : vector<32x128xf32>
    %c64 = arith.constant 64 : index
    %c0_5 = arith.constant 0 : index
    %8 = vector.load %arg1[%c64, %c0_5] : memref<320x128xf32, #tpu.memory_space<vmem>>, vector<64x32xf32>
    %c64_6 = arith.constant 64 : index
    %c32 = arith.constant 32 : index
    %9 = vector.load %arg1[%c64_6, %c32] : memref<320x128xf32, #tpu.memory_space<vmem>>, vector<64x1xf32>
    %cst_7 = arith.constant dense<0.000000e+00> : vector<64x128xf32>
    %10 = tpu.matmul %8, %7, %cst_7 {dimension_numbers = #tpu.dot_dimension_numbers<[1], [0], [0], [1], [0, 0, 1, 1], [], []>} : vector<64x32xf32>, vector<32x128xf32>, vector<64x128xf32> -> vector<64x128xf32>
    %11 = vector.broadcast %9 : vector<64x1xf32> to vector<64x128xf32>
    %12 = arith.addf %10, %11 : vector<64x128xf32>
    %cst_8 = arith.constant 0.000000e+00 : f32
    %13 = vector.broadcast %cst_8 : f32 to vector<64x128xf32>
    %14 = arith.maximumf %12, %13 : vector<64x128xf32>
    %c128 = arith.constant 128 : index
    %c0_9 = arith.constant 0 : index
    %15 = vector.load %arg1[%c128, %c0_9] : memref<320x128xf32, #tpu.memory_space<vmem>>, vector<32x64xf32>
    %c128_10 = arith.constant 128 : index
    %c64_11 = arith.constant 64 : index
    %16 = vector.load %arg1[%c128_10, %c64_11] : memref<320x128xf32, #tpu.memory_space<vmem>>, vector<32x1xf32>
    %cst_12 = arith.constant dense<0.000000e+00> : vector<32x128xf32>
    %17 = tpu.matmul %15, %14, %cst_12 {dimension_numbers = #tpu.dot_dimension_numbers<[1], [0], [0], [1], [0, 0, 1, 1], [], []>} : vector<32x64xf32>, vector<64x128xf32>, vector<32x128xf32> -> vector<32x128xf32>
    %18 = vector.broadcast %16 : vector<32x1xf32> to vector<32x128xf32>
    %19 = arith.addf %17, %18 : vector<32x128xf32>
    %cst_13 = arith.constant 0.000000e+00 : f32
    %20 = vector.broadcast %cst_13 : f32 to vector<32x128xf32>
    %21 = arith.maximumf %19, %20 : vector<32x128xf32>
    %c192 = arith.constant 192 : index
    %c0_14 = arith.constant 0 : index
    %22 = vector.load %arg1[%c192, %c0_14] : memref<320x128xf32, #tpu.memory_space<vmem>>, vector<16x32xf32>
    %c192_15 = arith.constant 192 : index
    %c32_16 = arith.constant 32 : index
    %23 = vector.load %arg1[%c192_15, %c32_16] : memref<320x128xf32, #tpu.memory_space<vmem>>, vector<16x1xf32>
    %cst_17 = arith.constant dense<0.000000e+00> : vector<16x128xf32>
    %24 = tpu.matmul %22, %21, %cst_17 {dimension_numbers = #tpu.dot_dimension_numbers<[1], [0], [0], [1], [0, 0, 1, 1], [], []>} : vector<16x32xf32>, vector<32x128xf32>, vector<16x128xf32> -> vector<16x128xf32>
    %25 = vector.broadcast %23 : vector<16x1xf32> to vector<16x128xf32>
    %26 = arith.addf %24, %25 : vector<16x128xf32>
    %cst_18 = arith.constant 0.000000e+00 : f32
    %27 = vector.broadcast %cst_18 : f32 to vector<16x128xf32>
    %28 = arith.maximumf %26, %27 : vector<16x128xf32>
    %c256 = arith.constant 256 : index
    %c0_19 = arith.constant 0 : index
    %29 = vector.load %arg1[%c256, %c0_19] : memref<320x128xf32, #tpu.memory_space<vmem>>, vector<2x16xf32>
    %c256_20 = arith.constant 256 : index
    %c16 = arith.constant 16 : index
    %30 = vector.load %arg1[%c256_20, %c16] : memref<320x128xf32, #tpu.memory_space<vmem>>, vector<2x1xf32>
    %cst_21 = arith.constant dense<0.000000e+00> : vector<2x128xf32>
    %31 = tpu.matmul %29, %28, %cst_21 {dimension_numbers = #tpu.dot_dimension_numbers<[1], [0], [0], [1], [0, 0, 1, 1], [], []>} : vector<2x16xf32>, vector<16x128xf32>, vector<2x128xf32> -> vector<2x128xf32>
    %32 = vector.broadcast %30 : vector<2x1xf32> to vector<2x128xf32>
    %33 = arith.addf %31, %32 : vector<2x128xf32>
    %c0_22 = arith.constant 0 : index
    %c0_23 = arith.constant 0 : index
    %34 = vector.load %arg3[%c0_22, %c0_23] : memref<2x128xf32, #tpu.memory_space<vmem>>, vector<2x128xf32>
    tpu.vector_store %arg3[%c0_22, %c0_23], %33 {strides = array<i32>} : memref<2x128xf32, #tpu.memory_space<vmem>>, vector<2x128xf32>,
    return
  }
  func.func @transform_0(%arg0: i32) -> (i32, i32) {
    %c0_i32 = arith.constant 0 : i32
    %c0_i32_0 = arith.constant 0 : i32
    %c0_i32_1 = arith.constant 0 : i32
    return %c0_i32, %c0_i32_0 : i32, i32
  }
  func.func @transform_1(%arg0: i32) -> (i32, i32) {
    %c0_i32 = arith.constant 0 : i32
    %c0_i32_0 = arith.constant 0 : i32
    return %arg0, %c0_i32 : i32, i32
  }
  func.func @transform_2(%arg0: i32) -> (i32, i32) {
    %c0_i32 = arith.constant 0 : i32
    %c0_i32_0 = arith.constant 0 : i32
    return %c0_i32, %arg0 : i32, i32
  }
}

</mosaic_0001>

<bundles_post_ra>
// kernel: forward.1
= control target key start
LH: loop header
LB: loop body
LE: loop exit
PB: predicated region body
PF: predicated region fallthrough
CT: control target
= control target key end

     0   :  { %7 = vsyncpa [#allocation3], 0  ;;  %s1079_s0 = inlined_call_operand.hbm [shape: f32[320,128], index: 0, kind: input, shape index: {}]   ;;  %s1080_s1 = inlined_call_operand.vmem [shape: f32[128,4], index: 1, kind: input, shape index: {}]   ;;  %s1081_s2 = inlined_call_operand.hbm [shape: f32[2,128], index: 2, kind: output, shape index: {}]  }
   0x1   :  { %8 = vsyncpa [#allocation4], 0  ;;  %s950_s9 = smov [#allocation2]  }
   0x2   :  { %s14_s10 = sshll.u32 %s950_s9, 4  ;;  %s15_s10 = int_to_ptr.vmem [resolvable:$true] %s14_s10 }
   0x3   :  { %s914_s11 = scalar_lea.vmem %s15_s10, 5120  ;;  %p919_p1 = scmp.lt.s32.totalorder %s15_s10, %s15_s10 }
   0x4   :  { %p915_p0 = scmp.ne.s32.totalorder %s15_s10, %s914_s11  ;;  %p920_p2 = scmp.lt.s32.totalorder %s914_s11, %s914_s11 }
   0x6   :  { %p921_p3 = por %p920_p2, %p919_p1 }
   0x8   :  { %p922_p4 = pnand %p921_p3, %p915_p0 }
   0xa   :  { %925 = shalt.err (!%p922_p4)
}
   0xb   :  { %s951_s12 = smov 128   ;;  %s952_s13 = smov 8  }
   0xc   :  { %20 = dma.hbm_to_vmem [thread:$0]  %s1079_s0, 5120, %s15_s10, [#allocation3], %s951_s12, %s951_s12, %s952_s13  }
   0xd   :  { %946 = dma.done.wait [#allocation3], 5120  }
   0xe   :  { %947 = vsyncadd [#allocation3], 4294962176  ;;  %v953_v0 = vmov 4   ;;  %vm66_vm0 = vcmask 31744   ;;  %v45_v1 = vld [vmem:[%s1080_s1 + $0x78] sm:$0xff]  ;;  %v44_v2 = vld [vmem:[%s1080_s1 + $0x70] sm:$0xff] }
   0xf   :  { %897 = vset.pattern.permute.xlu1 %v953_v0  ;;  %896 = vset.pattern.permute.xlu0 %v953_v0  ;;  %v43_v3 = vld [vmem:[%s1080_s1 + $0x68] sm:$0xff]  ;;  %v26_v4 = vld [vmem:[#allocation2] sm:$0xff]  ;;  %v29_v5 = vld [vmem:[#allocation2 + $0x18] sm:$0xff]  ;;  %vm260_vm1 = vcmask 261120   ;;  %v954_v24 = vmov 32   ;;  %vm414_vm2 = vcmask 523264  }
  0x10   :  { %788 = vmatprep.subr.msk.mxu0 %vm66_vm0, %v45_v1  ;;  %820 = vmatprep.mubr.msk.f32.mxu0 %vm66_vm0, %v26_v4  ;;  %v27_v6 = vld [vmem:[#allocation2 + $0x8] sm:$0xff]  ;;  %v42_v7 = vld [vmem:[%s1080_s1 + $0x60] sm:$0xff]  ;;  %v28_v8 = vld [vmem:[#allocation2 + $0x10] sm:$0xff]  ;;  %v955_v49 = vmov 64   ;;  %vm957_vm3 = vmmov 0   ;;  %vm611_vm4 = vcmask 130048  }
  0x11   :  { %789 = vmatpush3.xpose.msk.msra.mxu0 %vm66_vm0, %v45_v1  ;;  %63 = vperm.xlu0 %896, %v29_v5   ;;  %v41_v9 = vld [vmem:[%s1080_s1 + $0x58] sm:$0xff]  ;;  %v40_v10 = vld [vmem:[%s1080_s1 + $0x50] sm:$0xff]  ;;  %v39_v11 = vld [vmem:[%s1080_s1 + $0x48] sm:$0xff] }
  0x12   :  { %790 = vmatprep.subr.msk.mxu0 %vm66_vm0, %v44_v2  ;;  %53 = vperm.xlu1 %897, %v27_v6   ;;  %v38_v12 = vld [vmem:[%s1080_s1 + $0x40] sm:$0xff]  ;;  %v37_v13 = vld [vmem:[%s1080_s1 + $0x38] sm:$0xff]  ;;  %v36_v14 = vld [vmem:[%s1080_s1 + $0x30] sm:$0xff] }
  0x13   :  { %v35_v15 = vld [vmem:[%s1080_s1 + $0x28] sm:$0xff]  ;;  %v34_v16 = vld [vmem:[%s1080_s1 + $0x20] sm:$0xff]  ;;  %v33_v17 = vld [vmem:[%s1080_s1 + $0x18] sm:$0xff] }
  0x14   :  { %v32_v18 = vld [vmem:[%s1080_s1 + $0x10] sm:$0xff]  ;;  %v31_v19 = vld [vmem:[%s1080_s1 + $0x8] sm:$0xff]  ;;  %v30_v20 = vld [vmem:[%s1080_s1] sm:$0xff]  ;;  %s959_s1 = smov [#allocation5]  }
  0x15   :  { %791 = vmatpush3.xpose.msk.msra.mxu0 %vm66_vm0, %v44_v2  ;;  %58 = vperm.xlu0 %896, %v28_v8   ;;  %v212_v21 = vld [vmem:[#allocation2 + $0x40] sm:$0xff]  ;;  %v218_v22 = vld [vmem:[#allocation2 + $0x70] sm:$0xff]  ;;  %v219_v23 = vld [vmem:[#allocation2 + $0x78] sm:$0xff]  ;;  %s691_s19 = sshll.u32 %s959_s1, 4  ;;  %s692_s19 = int_to_ptr.vmem [resolvable:$true] %s691_s19 }
  0x16   :  { %792 = vmatprep.subr.msk.mxu0 %vm66_vm0, %v43_v3  ;;  %48 = vperm.xlu1 %897, %v26_v4   ;;  %v216_v25 = vld [vmem:[#allocation2 + $0x60] sm:$0xff]  ;;  %v217_v26 = vld [vmem:[#allocation2 + $0x68] sm:$0xff]  ;;  %v214_v27 = vld [vmem:[#allocation2 + $0x50] sm:$0xff]  ;;  %s926_s0 = scalar_lea.vmem %s692_s19, 32  ;;  %p931_p6 = scmp.lt.s32.totalorder %s692_s19, %s692_s19 }
  0x17   :  { %834 = vmatprep.mubr.msk.f32.mxu1 %vm260_vm1, %v212_v21  ;;  %v215_v28 = vld [vmem:[#allocation2 + $0x58] sm:$0xff]  ;;  %v213_v29 = vld [vmem:[#allocation2 + $0x48] sm:$0xff]  ;;  %v390_v46 = vld [vmem:[#allocation2 + $0x80] sm:$0xff]  ;;  %p927_p5 = scmp.ne.s32.totalorder %s692_s19, %s926_s0  ;;  %p932_p7 = scmp.lt.s32.totalorder %s926_s0, %s926_s0 }
  0x18   :  { %v392_v47 = vld [vmem:[#allocation2 + $0x90] sm:$0xff]  ;;  %v393_v48 = vld [vmem:[#allocation2 + $0x98] sm:$0xff]  ;;  %v391_v50 = vld [vmem:[#allocation2 + $0x88] sm:$0xff] }
  0x19   :  { %793 = vmatpush3.xpose.msk.msra.mxu0 %vm66_vm0, %v43_v3  ;;  %898 = vset.pattern.permute.xlu0 %v954_v24  ;;  %p933_p8 = por %p932_p7, %p931_p6 }
  0x1a   :  { %794 = vmatprep.subr.msk.mxu0 %vm66_vm0, %v42_v7  ;;  %899 = vset.pattern.permute.xlu1 %v954_v24 }
  0x1b   :  { %252 = vperm.xlu1 %899, %v218_v22   ;;  %257 = vperm.xlu0 %898, %v219_v23   ;;  %p934_p9 = pnand %p933_p8, %p927_p5 }
  0x1d   :  { %795 = vmatpush3.xpose.msk.msra.mxu0 %vm66_vm0, %v42_v7 }
  0x1e   :  { %796 = vmatprep.subr.msk.mxu0 %vm66_vm0, %v41_v9 }
  0x1f   :  { %247 = vperm.xlu1 %899, %v217_v26   ;;  %242 = vperm.xlu0 %898, %v216_v25  }
  0x21   :  { %797 = vmatpush3.xpose.msk.msra.mxu0 %vm66_vm0, %v41_v9 }
  0x22   :  { %798 = vmatprep.subr.msk.mxu0 %vm66_vm0, %v40_v10 }
  0x23   :  { %237 = vperm.xlu1 %899, %v215_v28   ;;  %232 = vperm.xlu0 %898, %v214_v27  }
  0x25   :  { %799 = vmatpush3.xpose.msk.msra.mxu0 %vm66_vm0, %v40_v10 }
  0x26   :  { %800 = vmatprep.subr.msk.mxu0 %vm66_vm0, %v39_v11 }
  0x27   :  { %227 = vperm.xlu1 %899, %v213_v29   ;;  %222 = vperm.xlu0 %898, %v212_v21  }
  0x29   :  { %801 = vmatpush3.xpose.msk.msra.mxu0 %vm66_vm0, %v39_v11 }
  0x2a   :  { %802 = vmatprep.subr.msk.mxu0 %vm66_vm0, %v38_v12 }
  0x2b   :  { %900 = vset.pattern.permute.xlu1 %v955_v49  ;;  %901 = vset.pattern.permute.xlu0 %v955_v49 }
  0x2c   :  { %411 = vperm.xlu1 %900, %v393_v48   ;;  %406 = vperm.xlu0 %901, %v392_v47  }
  0x2d   :  { %803 = vmatpush3.xpose.msk.msra.mxu0 %vm66_vm0, %v38_v12 }
  0x2e   :  { %804 = vmatprep.subr.msk.mxu0 %vm66_vm0, %v37_v13 }
  0x30   :  { %401 = vperm.xlu1 %900, %v391_v50   ;;  %902 = vset.pattern.permute.xlu0 %v954_v24 }
  0x31   :  { %805 = vmatpush3.xpose.msk.msra.mxu0 %vm66_vm0, %v37_v13 }
  0x32   :  { %806 = vmatprep.subr.msk.mxu0 %vm66_vm0, %v36_v14 }
  0x34   :  { %396 = vperm.xlu1 %900, %v390_v46  }
  0x35   :  { %807 = vmatpush3.xpose.msk.msra.mxu0 %vm66_vm0, %v36_v14 }
  0x36   :  { %808 = vmatprep.subr.msk.mxu0 %vm66_vm0, %v35_v15 }
  0x38   :  { %903 = vset.pattern.permute.xlu1 %v954_v24 }
  0x39   :  { %809 = vmatpush3.xpose.msk.msra.mxu0 %vm66_vm0, %v35_v15 }
  0x3a   :  { %810 = vmatprep.subr.msk.mxu0 %vm66_vm0, %v34_v16 }
  0x3d   :  { %811 = vmatpush3.xpose.msk.msra.mxu0 %vm66_vm0, %v34_v16 }
  0x3e   :  { %812 = vmatprep.subr.msk.mxu0 %vm66_vm0, %v33_v17 }
  0x41   :  { %813 = vmatpush3.xpose.msk.msra.mxu0 %vm66_vm0, %v33_v17 }
  0x42   :  { %814 = vmatprep.subr.msk.mxu0 %vm66_vm0, %v32_v18 }
  0x45   :  { %815 = vmatpush3.xpose.msk.msra.mxu0 %vm66_vm0, %v32_v18 }
  0x46   :  { %816 = vmatprep.subr.msk.mxu0 %vm66_vm0, %v31_v19 }
  0x49   :  { %817 = vmatpush3.xpose.msk.msra.mxu0 %vm66_vm0, %v31_v19  ;;  %v512_v19 = vld [vmem:[#allocation2 + $0xc0] sm:$0xff] }
  0x4a   :  { %818 = vmatprep.subr.msk.mxu0 %vm66_vm0, %v30_v20  ;;  %516 = vperm.xlu1 %903, %v512_v19  }
  0x4d   :  { %819 = vmatpush3.xpose.msk.msra.mxu0 %vm66_vm0, %v30_v20  ;;  %v513_v20 = vld [vmem:[#allocation2 + $0xc8] sm:$0xff] }
  0x4e   :  { %521 = vperm.xlu0 %902, %v513_v20  }
  0x50   :  { %821 = vmatmul.mubr.msk.f32.vlgmr.msra.gmra.mxu0 %vm66_vm0, %v27_v6 }
  0x51   :  { %823 = vmatprep.mubr.msk.f32.mxu0 %vm66_vm0, %v28_v8 }
  0x54   :  { %824 = vmatmul.mubr.msk.f32.gmra.mxu0 %vm66_vm0, %v29_v5 }
  0x8c   :  { %v64_v30 = vpop.permute.xlu0 %63 }
  0x8d   :  { %v54_v31 = vpop.permute.xlu1 %53 }
  0x90   :  { %v59_v35 = vpop.permute.xlu0 %58 }
  0x91   :  { %v49_v37 = vpop.permute.xlu1 %48 }
  0x96   :  { %v253_v52 = vpop.permute.xlu1 %252  ;;  %v258_v54 = vpop.permute.xlu0 %257 }
  0x9a   :  { %v248_v57 = vpop.permute.xlu1 %247  ;;  %v243_v59 = vpop.permute.xlu0 %242 }
  0x9e   :  { %v238_v63 = vpop.permute.xlu1 %237  ;;  %v233_v4 = vpop.permute.xlu0 %232 }
  0xa2   :  { %v228_v9 = vpop.permute.xlu1 %227  ;;  %v223_v12 = vpop.permute.xlu0 %222 }
  0xa7   :  { %v412_v21 = vpop.permute.xlu1 %411 }
 0x110   :  { %v822_v32 = vpop.f32.mrf.mxu0 }
 0x111   :  { %v195_v39 = vadd.f32 %v822_v32, %v54_v31 }
 0x112   :  { %v189_v33 = vpop.f32.mrf.mxu0 }
 0x113   :  { %v190_v42 = vadd.f32 %v189_v33, %v49_v37  ;;  %v209_v44 = vmax.f32 %v195_v39, 0.0  ;;  %v956_v37 = vmov 0.0   ;;  %v958_v39 = vmov 16  }
 0x114   :  { %v825_v34 = vpop.f32.mrf.mxu0  ;;  %904 = vset.pattern.permute.xlu1 %v958_v39  ;;  %905 = vset.pattern.permute.xlu0 %v958_v39 }
 0x115   :  { %v205_v36 = vadd.f32 %v825_v34, %v64_v30  ;;  %v208_v45 = vmax.f32 %v190_v42, 0.0 }
 0x116   :  { %v199_v38 = vpop.f32.mrf.mxu0 }
 0x117   :  { %v211_v40 = vmax.f32 %v205_v36, 0.0  ;;  %v200_v41 = vadd.f32 %v199_v38, %v59_v35  ;;  %v605_v38 = vld [vmem:[#allocation2 + $0x100] sm:$0x3] }
 0x118   :  { %608 = vperm.xlu1 %904, %v605_v38  }
 0x119   :  { %v210_v43 = vmax.f32 %v200_v41, 0.0  ;;  %826 = vmatprep.subr.mxu1 %v211_v40 }
 0x11a   :  { %827 = vmatpush3.msra.mxu1 %v211_v40 }
 0x11b   :  { %828 = vmatprep.subr.mxu1 %v210_v43 }
 0x11c   :  { %829 = vmatpush3.msra.mxu1 %v210_v43 }
 0x11d   :  { %830 = vmatprep.subr.mxu1 %v209_v44 }
 0x11e   :  { %831 = vmatpush3.msra.mxu1 %v209_v44 }
 0x11f   :  { %832 = vmatprep.subr.mxu1 %v208_v45 }
 0x120   :  { %833 = vmatpush3.msra.mxu1 %v208_v45 }
 0x121   :  { %835 = vmatmul.mubr.msk.f32.vlgmr.msra.gmra.mxu1 %vm260_vm1, %v213_v29 }
 0x122   :  { %837 = vmatprep.mubr.msk.f32.mxu1 %vm260_vm1, %v214_v27 }
 0x125   :  { %838 = vmatmul.mubr.msk.f32.gmra.mxu1 %vm260_vm1, %v215_v28 }
 0x126   :  { %840 = vmatprep.mubr.msk.f32.mxu1 %vm260_vm1, %v216_v25 }
 0x129   :  { %841 = vmatmul.mubr.msk.f32.gmra.mxu1 %vm260_vm1, %v217_v26  ;;  %v407_v26 = vpop.permute.xlu0 %406 }
 0x12a   :  { %843 = vmatprep.mubr.msk.f32.mxu1 %vm260_vm1, %v218_v22  ;;  %v402_v22 = vpop.permute.xlu1 %401 }
 0x12d   :  { %844 = vmatmul.mubr.msk.f32.gmra.mxu1 %vm260_vm1, %v219_v23  ;;  %v522_v40 = vpop.permute.xlu0 %521 }
 0x12e   :  { %862 = vmatprep.mubr.msk.f32.mxu1 %vm414_vm2, %v390_v46  ;;  %v397_v28 = vpop.permute.xlu1 %396 }
 0x132   :  { %v517_v42 = vpop.permute.xlu1 %516 }
 0x1e1   :  { %v836_v51 = vpop.f32.mrf.mxu1 }
 0x1e2   :  { %v349_v13 = vadd.f32 %v836_v51, %v228_v9 }
 0x1e3   :  { %v343_v53 = vpop.f32.mrf.mxu1 }
 0x1e4   :  { %v344_v15 = vadd.f32 %v343_v53, %v223_v12  ;;  %v383_v17 = vmax.f32 %v349_v13, 0.0 }
 0x1e5   :  { %v839_v55 = vpop.f32.mrf.mxu1 }
 0x1e6   :  { %v359_v7 = vadd.f32 %v839_v55, %v238_v63  ;;  %v382_v18 = vmax.f32 %v344_v15, 0.0 }
 0x1e7   :  { %v353_v56 = vpop.f32.mrf.mxu1 }
 0x1e8   :  { %v354_v10 = vadd.f32 %v353_v56, %v233_v4  ;;  %v385_v14 = vmax.f32 %v359_v7, 0.0 }
 0x1e9   :  { %v842_v58 = vpop.f32.mrf.mxu1 }
 0x1ea   :  { %v369_v1 = vadd.f32 %v842_v58, %v248_v57  ;;  %v384_v16 = vmax.f32 %v354_v10, 0.0 }
 0x1eb   :  { %v363_v60 = vpop.f32.mrf.mxu1 }
 0x1ec   :  { %v364_v5 = vadd.f32 %v363_v60, %v243_v59  ;;  %v387_v8 = vmax.f32 %v369_v1, 0.0 }
 0x1ed   :  { %v845_v61 = vpop.f32.mrf.mxu1 }
 0x1ee   :  { %v379_v62 = vadd.f32 %v845_v61, %v258_v54  ;;  %v386_v11 = vmax.f32 %v364_v5, 0.0 }
 0x1ef   :  { %v373_v0 = vpop.f32.mrf.mxu1 }
 0x1f0   :  { %v389_v2 = vmax.f32 %v379_v62, 0.0  ;;  %v374_v3 = vadd.f32 %v373_v0, %v253_v52 }
 0x1f2   :  { %v388_v6 = vmax.f32 %v374_v3, 0.0  ;;  %846 = vmatprep.subr.mxu1 %v389_v2 }
 0x1f3   :  { %847 = vmatpush3.msra.mxu1 %v389_v2 }
 0x1f4   :  { %848 = vmatprep.subr.mxu1 %v388_v6 }
 0x1f5   :  { %849 = vmatpush3.msra.mxu1 %v388_v6 }
 0x1f6   :  { %850 = vmatprep.subr.mxu1 %v387_v8 }
 0x1f7   :  { %851 = vmatpush3.msra.mxu1 %v387_v8 }
 0x1f8   :  { %852 = vmatprep.subr.mxu1 %v386_v11 }
 0x1f9   :  { %853 = vmatpush3.msra.mxu1 %v386_v11 }
 0x1fa   :  { %854 = vmatprep.subr.mxu1 %v385_v14 }
 0x1fb   :  { %855 = vmatpush3.msra.mxu1 %v385_v14 }
 0x1fc   :  { %856 = vmatprep.subr.mxu1 %v384_v16 }
 0x1fd   :  { %857 = vmatpush3.msra.mxu1 %v384_v16 }
 0x1fe   :  { %858 = vmatprep.subr.mxu1 %v383_v17 }
 0x1ff   :  { %859 = vmatpush3.msra.mxu1 %v383_v17 }
 0x200   :  { %860 = vmatprep.subr.mxu1 %v382_v18 }
 0x201   :  { %861 = vmatpush3.msra.mxu1 %v382_v18 }
 0x202   :  { %863 = vmatmul.mubr.msk.f32.vlgmr.msra.gmra.mxu1 %vm414_vm2, %v391_v50 }
 0x203   :  { %865 = vmatprep.mubr.msk.f32.mxu1 %vm414_vm2, %v392_v47 }
 0x206   :  { %866 = vmatmul.mubr.msk.f32.gmra.mxu1 %vm414_vm2, %v393_v48  ;;  %v609_v48 = vpop.permute.xlu1 %608 }
 0x207   :  { %876 = vmatprep.mubr.msk.f32.mxu1 %vm260_vm1, %v512_v19 }
 0x2c2   :  { %v864_v23 = vpop.f32.mrf.mxu1 }
 0x2c3   :  { %v495_v30 = vadd.f32 %v864_v23, %v402_v22 }
 0x2c4   :  { %v489_v24 = vpop.f32.mrf.mxu1 }
 0x2c5   :  { %v490_v33 = vadd.f32 %v489_v24, %v397_v28  ;;  %v509_v35 = vmax.f32 %v495_v30, 0.0 }
 0x2c6   :  { %v867_v25 = vpop.f32.mrf.mxu1 }
 0x2c7   :  { %v505_v27 = vadd.f32 %v867_v25, %v412_v21  ;;  %v508_v36 = vmax.f32 %v490_v33, 0.0 }
 0x2c8   :  { %v499_v29 = vpop.f32.mrf.mxu1 }
 0x2c9   :  { %v511_v31 = vmax.f32 %v505_v27, 0.0  ;;  %v500_v32 = vadd.f32 %v499_v29, %v407_v26 }
 0x2cb   :  { %v510_v34 = vmax.f32 %v500_v32, 0.0  ;;  %868 = vmatprep.subr.mxu1 %v511_v31 }
 0x2cc   :  { %869 = vmatpush3.msra.mxu1 %v511_v31 }
 0x2cd   :  { %870 = vmatprep.subr.mxu1 %v510_v34 }
 0x2ce   :  { %871 = vmatpush3.msra.mxu1 %v510_v34 }
 0x2cf   :  { %872 = vmatprep.subr.mxu1 %v509_v35 }
 0x2d0   :  { %873 = vmatpush3.msra.mxu1 %v509_v35 }
 0x2d1   :  { %874 = vmatprep.subr.mxu1 %v508_v36 }
 0x2d2   :  { %875 = vmatpush3.msra.mxu1 %v508_v36 }
 0x2d3   :  { %877 = vmatmul.mubr.msk.f32.vlgmr.msra.gmra.mxu1 %vm260_vm1, %v513_v20  ;;  %879 = vmatprep.subr.mxu1 %v956_v37 }
 0x2d4   :  { %883 = vmatprep.mubr.msk.f32.mxu1 %vm957_vm3, %v956_v37 }
 0x393   :  { %v878_v41 = vpop.f32.mrf.mxu1 }
 0x394   :  { %v600_v43 = vadd.f32 %v878_v41, %v522_v40 }
 0x395   :  { %v594_v44 = vpop.f32.mrf.mxu1 }
 0x396   :  { %v604_v45 = vmax.f32 %v600_v43, 0.0  ;;  %v595_v46 = vadd.f32 %v594_v44, %v517_v42 }
 0x398   :  { %v603_v47 = vmax.f32 %v595_v46, 0.0  ;;  %880 = vmatpush3.msra.mxu1 %v604_v45 }
 0x399   :  { %881 = vmatprep.subr.mxu1 %v956_v37 }
 0x39a   :  { %882 = vmatpush3.msra.mxu1 %v603_v47 }
 0x39b   :  { %884 = vmatmul.mubr.msk.f32.vlgmr.msra.gmra.mxu1 %vm611_vm4, %v605_v38 }
 0x45b   :  { %v680_v49 = vpop.f32.mrf.mxu1 }
 0x45c   :  { %v681_v50 = vadd.f32 %v680_v49, %v609_v48 }
 0x45d   :  { %v885_v51 = vpop.f32.mrf.mxu1 }
 0x45e   :  { %684 = vst [vmem:[#allocation5] sm:$0x3] %v681_v50 }
 0x45f   :  { %937 = shalt.err (!%p934_p9)
}
 0x460   :  { %694 = dma.vmem_to_hbm [thread:$0]  %s692_s19, 32, %s1081_s2, [#allocation4]  }
 0x461   :  { %948 = dma.done.wait [#allocation4], 32  }
 0x462   :  { %949 = vsyncadd [#allocation4], 4294967264 }
 0x463   :  { %698 = vsyncpa [#allocation3], 1 }
 0x464   :  { %699 = vsyncpa [#allocation4], 1 }

</bundles_post_ra>
